<compile_context>
chip_gen: v5e
topology: v5e:2x2
jax: 0.10.0
libtpu: 0.0.40
codegen_flags: <defaults>
</compile_context>

<pallas_src>
import functools

import jax
import jax.numpy as jnp
from jax import lax
from jax.experimental import pallas as pl
from jax.experimental.pallas import tpu as pltpu


def _focal_loss_kernel(x_ref, y_ref, *rest, gamma, class_axis, total_pix,
                       apply_mask, has_alpha):
    """One (batch, pixel-tile) grid step.

    dense path   : x (1, C, sp, 128), y (1, 1, sp, 128), alpha (1, C, 1, 1)
    ragged path  : x (1, 1, C, tp),   y (1, 1, 1, tp),   alpha (1, 1, C, 1)
    out          : (1, 1, 1, 128) f32 partial sums.
    """
    if has_alpha:
        a_ref, out_ref = rest
    else:
        (out_ref,) = rest

    x = x_ref[...].astype(jnp.float32)       # upcast in-kernel (bf16 stays bf16 in HBM)
    y = y_ref[...].astype(jnp.int32)         # narrow target stream, upcast here

    # Numerically stable log-softmax over the class axis.  On the dense path
    # classes are a *leading* block axis so these are pure VPU elementwise
    # passes over (sp, 128) vregs.
    m = jnp.max(x, axis=class_axis, keepdims=True)
    lse = m + jnp.log(jnp.sum(jnp.exp(x - m), axis=class_axis, keepdims=True))

    cls = lax.broadcasted_iota(jnp.int32, x.shape, class_axis)
    onehot = cls == y

    # x[pix, y[pix]] gather via a masked class reduction.
    x_t = jnp.sum(jnp.where(onehot, x, 0.0), axis=class_axis, keepdims=True)
    logpt = x_t - lse
    pt = jnp.exp(logpt)

    if has_alpha:
        # alpha[y] gather with the same onehot mask (fine for segmentation-
        # scale C).
        # TODO(synk): for very large C precompute alpha[y] in the wrapper as a
        # per-pixel f32 stream instead of this extra O(C*tile) VPU pass.
        at = jnp.sum(jnp.where(onehot, a_ref[...], 0.0),
                     axis=class_axis, keepdims=True)
        logpt = logpt * at

    one_minus_pt = 1.0 - pt
    g = float(gamma)
    if g == int(g) and 0.0 <= g <= 16.0:
        # Integer gamma: repeated VPU multiplies (no EUP pow).
        focal = jnp.ones_like(pt)
        for _ in range(int(g)):
            focal = focal * one_minus_pt
    else:
        focal = one_minus_pt ** g

    loss = -1.0 * focal * logpt              # (1, 1, rows, lanes) per-pixel

    if apply_mask:
        # Ragged last tile: no HBM pad was done, so out-of-range rows/lanes of
        # this block hold garbage.  A *select* (not a multiply) keeps any
        # Inf/NaN there from propagating into the partial sum.
        rows, lanes = loss.shape[-2], loss.shape[-1]
        p = pl.program_id(1)
        row = lax.broadcasted_iota(jnp.int32, loss.shape, 2)
        lane = lax.broadcasted_iota(jnp.int32, loss.shape, 3)
        pix = (p * rows + row) * lanes + lane
        loss = jnp.where(pix < total_pix, loss, 0.0)

    if loss.shape[-1] == 128:
        # Lane-dense partial: reduce over sublanes only; the wrapper finishes
        # the reduction with one tiny jnp.sum over all partials.
        out_ref[...] = jnp.sum(loss, axis=2, keepdims=True).astype(jnp.float32)
    else:
        # Ragged-P fallback with a non-128 lane width: scalar partial, lane 0.
        s = jnp.sum(loss)
        lane128 = lax.broadcasted_iota(jnp.int32, (1, 1, 1, 128), 3)
        out_ref[...] = jnp.where(lane128 == 0, s, 0.0).astype(jnp.float32)


def _ceil_to(v, m):
    return -(-v // m) * m


def _sublane_align(*dtypes):
    """Sublane-tile alignment covering every dtype (32b->8, 16b->16, 8b->32)."""
    a = 8
    for dt in dtypes:
        bits = jnp.dtype(dt).itemsize * 8
        a = max(a, 256 // bits)
    return a


def _device_tuning():
    """(target_tile_elems, vmem_limit_bytes, logits_buffer_depth) per TPU gen."""
    kind = ""
    try:
        kind = (jax.devices()[0].device_kind or "").lower()
    except Exception:
        pass
    if "v7" in kind:     # 64 MiB VMEM/TC, 3.2 TB/s HBM: big tiles + deeper buffering
        return 1024 * 1024, 48 * 1024 * 1024, 3
    if "v6" in kind:     # 128 MiB VMEM, 1.4 TB/s
        return 1536 * 1024, 64 * 1024 * 1024, 2
    if "v5" in kind and ("lite" in kind or "5e" in kind):   # v5e: ~2 MiB tiles is the sweet spot
        return 512 * 1024, 32 * 1024 * 1024, 2
    return 768 * 1024, 32 * 1024 * 1024, 2   # conservative default (v4/v5p/unknown)


def focal_loss(x, y, *, gamma=2.0, alpha=None, reduction="mean",
               tile_pix=None, target_tile_elems=None):
    """x: (N, C, H, W) logits (any float dtype); y: (N, H, W) integer targets."""
    if reduction not in ("mean", "sum"):
        raise ValueError(f"{reduction} is not in ['mean', 'sum']")

    N, C, H, W = x.shape
    P = H * W

    auto_elems, vmem_limit, buf_depth = _device_tuning()
    if target_tile_elems is None:
        target_tile_elems = auto_elems

    # Narrow target stream (kernel upcasts to int32).  Ideally callers store
    # narrow labels already; the cast here is small next to the logits stream.
    if C <= 128:
        y_dtype = jnp.int8
    elif C <= 32767:
        y_dtype = jnp.int16
    else:
        y_dtype = jnp.int32
    if y.dtype != y_dtype:
        y = y.astype(y_dtype)

    has_alpha = alpha is not None
    dense = (P % 128 == 0)

    if dense:
        # Pixels viewed as (P//128, 128): sublane/lane dense, classes leading.
        SPT = P // 128
        x4 = x.reshape(N, C, SPT, 128)          # free reshapes, no pad, no copy
        y4 = y.reshape(N, 1, SPT, 128)
        align = _sublane_align(x.dtype, y_dtype)
        if tile_pix is not None:
            sp = max(align, (int(tile_pix) // 128) // align * align)
        else:
            sp = max(align, (target_tile_elems // (C * 128)) // align * align)
            # TODO(synk): for C >~ 4K one (C, align, 128) strip (+ ~4-5x f32
            # intermediates) no longer fits VMEM; add a class-chunk grid axis
            # with an online (running max / sum-exp) LSE and a wrapper-side
            # alpha[y] stream instead of clamping sp here.
        sp = min(sp, SPT)
        n_pt = pl.cdiv(SPT, sp)
        if tile_pix is None and N * n_pt < 2 and SPT >= 2 * align:
            # Megacore (v7x): never leave a TensorCore idle on tiny inputs.
            sp = min(SPT, _ceil_to(-(-SPT // 2), align))
            n_pt = pl.cdiv(SPT, sp)
        class_axis = 1
        pix_rows, pix_lanes = sp, 128
        x_block, x_imap = (1, C, sp, 128), (lambda b, p: (b, 0, p, 0))
        y_block, y_imap = (1, 1, sp, 128), (lambda b, p: (b, 0, p, 0))
        a_shape, a_block = (1, C, 1, 1), (1, C, 1, 1)
    else:
        # Ragged P: flat pixel (lane) axis, classes on sublanes, no HBM pad.
        x4 = x.reshape(N, 1, C, P)
        y4 = y.reshape(N, 1, 1, P)
        if tile_pix is not None:
            tp = min(int(tile_pix), P)
        elif C * P <= target_tile_elems:
            tp = P
        else:
            tp = max(128, (target_tile_elems // C) // 128 * 128)
        if tp < P:
            tp = max(128, tp // 128 * 128)      # lane dim: 128-multiple unless full
        else:
            tp = P
        n_pt = pl.cdiv(P, tp)
        if tile_pix is None and N * n_pt < 2 and P >= 256:
            tp = min(P, _ceil_to(-(-P // 2), 128))
            n_pt = pl.cdiv(P, tp)
        class_axis = 2
        pix_rows, pix_lanes = 1, tp
        x_block, x_imap = (1, 1, C, tp), (lambda b, p: (b, 0, 0, p))
        y_block, y_imap = (1, 1, 1, tp), (lambda b, p: (b, 0, 0, p))
        a_shape, a_block = (1, 1, C, 1), (1, 1, C, 1)

    kernel = functools.partial(
        _focal_loss_kernel, gamma=float(gamma), class_axis=class_axis,
        total_pix=P, apply_mask=(n_pt * pix_rows * pix_lanes != P),
        has_alpha=has_alpha)

    if buf_depth != 2:
        try:
            x_spec = pl.BlockSpec(x_block, x_imap,
                                  pipeline_mode=pl.Buffered(buf_depth))
        except Exception:       # pipeline_mode unavailable -> default depth
            x_spec = pl.BlockSpec(x_block, x_imap)
    else:
        x_spec = pl.BlockSpec(x_block, x_imap)

    in_specs = [x_spec, pl.BlockSpec(y_block, y_imap)]
    inputs = [x4, y4]
    if has_alpha:
        alpha_arr = jnp.asarray(alpha, dtype=jnp.float32).reshape(a_shape)
        in_specs.append(pl.BlockSpec(a_block, lambda b, p: (0, 0, 0, 0)))
        inputs.append(alpha_arr)

    partials = pl.pallas_call(
        kernel,
        out_shape=jax.ShapeDtypeStruct((N, n_pt, 1, 128), jnp.float32),
        grid_spec=pltpu.PrefetchScalarGridSpec(
            num_scalar_prefetch=0,
            grid=(N, n_pt),
            in_specs=in_specs,
            out_specs=pl.BlockSpec((1, 1, 1, 128), lambda b, p: (b, p, 0, 0)),
        ),
        compiler_params=pltpu.CompilerParams(
            dimension_semantics=("parallel", "parallel"),
            vmem_limit_bytes=int(vmem_limit),
        ),
    )(*inputs)

    total = jnp.sum(partials)               # tiny tree-sum of per-tile partials
    if reduction == "mean":
        return total / jnp.float32(N * P)
    return total


def _focal_loss_ref(x, y, *, gamma=2.0, alpha=None, reduction="mean"):
    """Pure-JAX reference (mirrors the PyTorch module)."""
    N, C, H, W = x.shape
    x2 = jnp.transpose(x, (0, 2, 3, 1)).reshape(-1, C).astype(jnp.float32)
    y2 = y.reshape(-1).astype(jnp.int32)
    logp = jax.nn.log_softmax(x2, axis=-1)
    logpt = jnp.take_along_axis(logp, y2[:, None], axis=-1)[:, 0]
    pt = jnp.exp(logpt)
    if alpha is not None:
        at = jnp.asarray(alpha, dtype=jnp.float32)[y2]
        logpt = logpt * at
    loss = -1.0 * (1.0 - pt) ** gamma * logpt
    return loss.mean() if reduction == "mean" else loss.sum()


if __name__ == "__main__":
    key = jax.random.PRNGKey(0)
    keys = jax.random.split(key, 8)

    # Case 1: canonical segmentation shape (dense path, P % 128 == 0),
    # integer gamma, per-class alpha, mean reduction, int8 target stream.
    x1 = jax.random.normal(keys[0], (2, 4, 16, 16), dtype=jnp.float32)
    y1 = jax.random.randint(keys[1], (2, 16, 16), 0, 4, dtype=jnp.int32)
    alpha1 = [0.25, 0.5, 0.75, 1.0]
    out1 = jax.block_until_ready(
        focal_loss(x1, y1, gamma=2.0, alpha=alpha1, reduction="mean"))
    ref1 = _focal_loss_ref(x1, y1, gamma=2.0, alpha=alpha1, reduction="mean")
    assert jnp.allclose(out1, ref1, rtol=1e-4, atol=1e-5), (out1, ref1)

    # Case 2: ragged P (fallback layout, NO pad), multi-tile grid with a
    # masked partial last tile, non-integer gamma, no alpha, sum reduction.
    x2 = jax.random.normal(keys[2], (1, 6, 10, 30), dtype=jnp.float32)
    y2 = jax.random.randint(keys[3], (1, 10, 30), 0, 6, dtype=jnp.int32)
    out2 = jax.block_until_ready(
        focal_loss(x2, y2, gamma=2.5, alpha=None, reduction="sum",
                   tile_pix=128))
    ref2 = _focal_loss_ref(x2, y2, gamma=2.5, alpha=None, reduction="sum")
    assert jnp.allclose(out2, ref2, rtol=1e-4, atol=1e-4), (out2, ref2)

    # Case 3: larger class count, bf16 logits kept bf16 in HBM, gamma=3.
    C3 = 128
    x3 = jax.random.normal(keys[4], (1, C3, 4, 8),
                           dtype=jnp.float32).astype(jnp.bfloat16)
    y3 = jax.random.randint(keys[5], (1, 4, 8), 0, C3, dtype=jnp.int32)
    alpha3 = [((i % 7) + 1) / 7.0 for i in range(C3)]
    out3 = jax.block_until_ready(
        focal_loss(x3, y3, gamma=3.0, alpha=alpha3, reduction="mean"))
    ref3 = _focal_loss_ref(x3.astype(jnp.float32), y3, gamma=3.0,
                           alpha=alpha3, reduction="mean")
    assert jnp.allclose(out3, ref3, rtol=1e-4, atol=1e-5), (out3, ref3)

    # Case 4: dense path with a ragged (masked) last sublane tile and the
    # forced >=2-step parallel grid (megacore split), no pad anywhere.
    xd = jax.random.normal(keys[6], (1, 3, 96, 128), dtype=jnp.float32)
    yd = jax.random.randint(keys[7], (1, 96, 128), 0, 3, dtype=jnp.int32)
    alphad = [0.3, 0.6, 1.0]
    outd = jax.block_until_ready(
        focal_loss(xd, yd, gamma=2.0, alpha=alphad, reduction="mean"))
    refd = _focal_loss_ref(xd, yd, gamma=2.0, alpha=alphad, reduction="mean")
    assert jnp.allclose(outd, refd, rtol=1e-4, atol=1e-5), (outd, refd)

    print("KERNEL_OK")
</pallas_src>

<mosaic_0001>
module attributes {stable_mosaic.version = 11 : i64} {
  func.func @_focal_loss_kernel(%arg0: i32, %arg1: i32, %arg2: memref<1x4x2x128xf32, #tpu.memory_space<vmem>>, %arg3: memref<1x1x2x128xi8, #tpu.memory_space<vmem>>, %arg4: memref<1x4x1x1xf32, #tpu.memory_space<vmem>>, %arg5: memref<1x1x1x128xf32, #tpu.memory_space<vmem>>) attributes {dimension_semantics = [#tpu.dimension_semantics<parallel>, #tpu.dimension_semantics<parallel>], iteration_bounds = array<i64: 2, 1>, scalar_prefetch = 0 : i64, scratch_operands = 0 : i64, tpu.core_type = #tpu.core_type<tc>, window_params = [{transform_indices = @transform_0, window_bounds = array<i64: 1, 4, 2, 128>}, {transform_indices = @transform_1, window_bounds = array<i64: 1, 1, 2, 128>}, {pipeline_mode = #tpu.pipeline_mode<synchronous>, transform_indices = @transform_2, window_bounds = array<i64: 1, 4, 1, 1>}, {transform_indices = @transform_3, window_bounds = array<i64: 1, 1, 1, 128>}]} {
    %c0 = arith.constant 0 : index
    %c0_0 = arith.constant 0 : index
    %c0_1 = arith.constant 0 : index
    %c0_2 = arith.constant 0 : index
    %0 = vector.load %arg2[%c0, %c0_0, %c0_1, %c0_2] : memref<1x4x2x128xf32, #tpu.memory_space<vmem>>, vector<1x4x2x128xf32>
    %c0_3 = arith.constant 0 : index
    %c0_4 = arith.constant 0 : index
    %c0_5 = arith.constant 0 : index
    %c0_6 = arith.constant 0 : index
    %1 = vector.load %arg3[%c0_3, %c0_4, %c0_5, %c0_6] : memref<1x1x2x128xi8, #tpu.memory_space<vmem>>, vector<1x1x2x128xi8>
    %2 = arith.extsi %1 : vector<1x1x2x128xi8> to vector<1x1x2x128xi32>
    %cst = arith.constant dense<0xFF800000> : vector<1x2x128xf32>
    %3 = vector.multi_reduction <maximumf>, %0, %cst [1] : vector<1x4x2x128xf32> to vector<1x2x128xf32>
    %4 = vector.shape_cast %3 : vector<1x2x128xf32> to vector<1x1x2x128xf32>
    %5 = vector.broadcast %4 : vector<1x1x2x128xf32> to vector<1x4x2x128xf32>
    %6 = arith.subf %0, %5 : vector<1x4x2x128xf32>
    %7 = math.exp %6 : vector<1x4x2x128xf32>
    %cst_7 = arith.constant dense<0.000000e+00> : vector<1x2x128xf32>
    %8 = vector.multi_reduction <add>, %7, %cst_7 [1] : vector<1x4x2x128xf32> to vector<1x2x128xf32>
    %9 = vector.shape_cast %8 : vector<1x2x128xf32> to vector<1x1x2x128xf32>
    %10 = math.log %9 : vector<1x1x2x128xf32>
    %11 = arith.addf %4, %10 : vector<1x1x2x128xf32>
    %12 = tpu.iota {dimensions = array<i32: 1>} : vector<1x4x2x128xi32>
    %13 = vector.broadcast %2 : vector<1x1x2x128xi32> to vector<1x4x2x128xi32>
    %14 = arith.cmpi eq, %12, %13 : vector<1x4x2x128xi32>
    %cst_8 = arith.constant 0.000000e+00 : f32
    %15 = vector.broadcast %cst_8 : f32 to vector<1x4x2x128xf32>
    %16 = arith.select %14, %0, %15 : vector<1x4x2x128xi1>, vector<1x4x2x128xf32>
    %cst_9 = arith.constant dense<0.000000e+00> : vector<1x2x128xf32>
    %17 = vector.multi_reduction <add>, %16, %cst_9 [1] : vector<1x4x2x128xf32> to vector<1x2x128xf32>
    %18 = vector.shape_cast %17 : vector<1x2x128xf32> to vector<1x1x2x128xf32>
    %19 = arith.subf %18, %11 : vector<1x1x2x128xf32>
    %20 = math.exp %19 : vector<1x1x2x128xf32>
    %c0_10 = arith.constant 0 : index
    %c0_11 = arith.constant 0 : index
    %c0_12 = arith.constant 0 : index
    %c0_13 = arith.constant 0 : index
    %21 = vector.load %arg4[%c0_10, %c0_11, %c0_12, %c0_13] : memref<1x4x1x1xf32, #tpu.memory_space<vmem>>, vector<1x4x1x1xf32>
    %cst_14 = arith.constant 0.000000e+00 : f32
    %22 = vector.shape_cast %21 : vector<1x4x1x1xf32> to vector<1x4x1x1xf32>
    %23 = vector.broadcast %22 : vector<1x4x1x1xf32> to vector<1x4x2x128xf32>
    %24 = vector.broadcast %cst_14 : f32 to vector<1x4x2x128xf32>
    %25 = arith.select %14, %23, %24 : vector<1x4x2x128xi1>, vector<1x4x2x128xf32>
    %cst_15 = arith.constant dense<0.000000e+00> : vector<1x2x128xf32>
    %26 = vector.multi_reduction <add>, %25, %cst_15 [1] : vector<1x4x2x128xf32> to vector<1x2x128xf32>
    %27 = vector.shape_cast %26 : vector<1x2x128xf32> to vector<1x1x2x128xf32>
    %28 = arith.mulf %19, %27 : vector<1x1x2x128xf32>
    %cst_16 = arith.constant 1.000000e+00 : f32
    %29 = vector.broadcast %cst_16 : f32 to vector<1x1x2x128xf32>
    %30 = arith.subf %29, %20 : vector<1x1x2x128xf32>
    %cst_17 = arith.constant 1.000000e+00 : f32
    %31 = vector.broadcast %cst_17 : f32 to vector<1x1x2x128xf32>
    %32 = arith.mulf %31, %30 : vector<1x1x2x128xf32>
    %33 = arith.mulf %32, %30 : vector<1x1x2x128xf32>
    %cst_18 = arith.constant -1.000000e+00 : f32
    %34 = vector.broadcast %cst_18 : f32 to vector<1x1x2x128xf32>
    %35 = arith.mulf %34, %33 : vector<1x1x2x128xf32>
    %36 = arith.mulf %35, %28 : vector<1x1x2x128xf32>
    %cst_19 = arith.constant dense<0.000000e+00> : vector<1x1x128xf32>
    %37 = vector.multi_reduction <add>, %36, %cst_19 [2] : vector<1x1x2x128xf32> to vector<1x1x128xf32>
    %38 = vector.shape_cast %37 : vector<1x1x128xf32> to vector<1x1x1x128xf32>
    %c0_20 = arith.constant 0 : index
    %c0_21 = arith.constant 0 : index
    %c0_22 = arith.constant 0 : index
    %c0_23 = arith.constant 0 : index
    %39 = vector.load %arg5[%c0_20, %c0_21, %c0_22, %c0_23] : memref<1x1x1x128xf32, #tpu.memory_space<vmem>>, vector<1x1x1x128xf32>
    tpu.vector_store %arg5[%c0_20, %c0_21, %c0_22, %c0_23], %38 {strides = array<i32>} : memref<1x1x1x128xf32, #tpu.memory_space<vmem>>, vector<1x1x1x128xf32>,
    return
  }
  func.func @transform_0(%arg0: i32, %arg1: i32) -> (i32, i32, i32, i32) {
    %c0_i32 = arith.constant 0 : i32
    %c0_i32_0 = arith.constant 0 : i32
    %c0_i32_1 = arith.constant 0 : i32
    return %arg0, %c0_i32, %arg1, %c0_i32_0 : i32, i32, i32, i32
  }
  func.func @transform_1(%arg0: i32, %arg1: i32) -> (i32, i32, i32, i32) {
    %c0_i32 = arith.constant 0 : i32
    %c0_i32_0 = arith.constant 0 : i32
    %c0_i32_1 = arith.constant 0 : i32
    return %arg0, %c0_i32, %arg1, %c0_i32_0 : i32, i32, i32, i32
  }
  func.func @transform_2(%arg0: i32, %arg1: i32) -> (i32, i32, i32, i32) {
    %c0_i32 = arith.constant 0 : i32
    %c0_i32_0 = arith.constant 0 : i32
    %c0_i32_1 = arith.constant 0 : i32
    %c0_i32_2 = arith.constant 0 : i32
    %c0_i32_3 = arith.constant 0 : i32
    return %c0_i32, %c0_i32_0, %c0_i32_1, %c0_i32_2 : i32, i32, i32, i32
  }
  func.func @transform_3(%arg0: i32, %arg1: i32) -> (i32, i32, i32, i32) {
    %c0_i32 = arith.constant 0 : i32
    %c0_i32_0 = arith.constant 0 : i32
    %c0_i32_1 = arith.constant 0 : i32
    return %arg0, %arg1, %c0_i32, %c0_i32_0 : i32, i32, i32, i32
  }
}

</mosaic_0001>

<bundles_post_ra>
// kernel: tpu_custom_call.1
= control target key start
LH: loop header
LB: loop body
LE: loop exit
PB: predicated region body
PF: predicated region fallthrough
CT: control target
= control target key end

     0   :  { %8 = vsyncpa [#allocation3], 0  ;;  %s836_s0 = inlined_call_operand.hbm [shape: f32[2,4,2,128], index: 0, kind: input, shape index: {}]   ;;  %s837_s1 = inlined_call_operand.vmem [shape: s8[2,1,2,128], index: 1, kind: input, shape index: {}]   ;;  %s838_s2 = inlined_call_operand.vmem [shape: f32[1,4,1,1], index: 2, kind: input, shape index: {}]   ;;  %s839_s3 = inlined_call_operand.hbm [shape: f32[2,1,1,128], index: 3, kind: output, shape index: {}]  }
   0x1   :  { %10 = vsyncpa [#allocation3 + $0x1], 0 }
   0x2   :  { %11 = vsyncpa [#allocation4], 0 }
   0x3   :  { %13 = vsyncpa [#allocation4 + $0x1], 0  ;;  %s673_s12 = smov 0   ;;  %s675_s13 = smov 0  }
   0x4   :  { %s677_s14 = smov 0   ;;  %s679_s15 = smov 0  }
   0x5   :  { %s681_s16 = smov 0   ;;  %s683_s17 = smov 0  }
   0x6 LB: > { %s441_s18 = sadd.s32 4294967295, %s648_s17   ;;  %s442_s19 = sadd.s32 4294967294, %s648_s17   ;;  %s648_s17 = sphi %s683_s17, %s19_s17   ;;  %s644_s16 = sphi %s681_s16, %s848_s16   ;;  %s640_s15 = sphi %s679_s15, %s847_s15   ;;  %s636_s14 = sphi %s677_s14, %s846_s14   ;;  %s632_s13 = sphi %s675_s13, %s845_s13   ;;  %s628_s12 = sphi %s673_s12, %s844_s12  }
   0x7   : > { %s31_s20 = sadd.s32 1, %s644_s16  ;;  %s40_s21 = sadd.s32 1, %s636_s14 }
   0x8   : > { %p33_p0 = scmp.ge.s32.totalorder %s31_s20, 2  ;;  %p47_p1 = scmp.ne.s32.totalorder %s636_s14, %s632_s13 }
   0x9   : > { %p48_p2 = scmp.eq.s32.totalorder %s648_s17, 0  ;;  %p53_p3 = scmp.ne.s32.totalorder %s632_s13, %s628_s12 }
   0xa   : > { %s850_s20 = smov (%p33_p0, %s31_s20), 0  ;;  %p54_p5 = scmp.eq.s32.totalorder %s441_s18, 0 }
   0xb   : > { %p714_p4 = por %p48_p2, %p47_p1  ;;  %s35_s23 = ssub.s32 %s644_s16, %s850_s20 }
   0xc   : > { %p128_p6 = scmp.eq.s32.totalorder %s441_s18, 1  ;;  %p38_p7 = scmp.eq.s32.totalorder %s35_s23, 0 }
   0xd   : > { %p720_p8 = por %p54_p5, %p53_p3  ;;  %p134_p10 = scmp.eq.s32.totalorder %s442_s19, 1 }
   0xe   : > { %p724_p9 = por %p128_p6, %p47_p1  ;;  %p444_p12 = scmp.ge.s32.totalorder %s648_s17, 2 }
   0xf   : > { %s729_s26 = scalar_select %p38_p7, %s636_s14, %s40_s21  }
  0x10   : > { %p731_p11 = por %p134_p10, %p53_p3  ;;  %p465_p13 = scmp.lt.s32.totalorder %s648_s17, 2 }
  0x11   : > { %s157_s28 = sand.u32 1, %s636_s14   ;;  %s452_s30 = sshll.u32 %s644_s16, 3 }
  0x12   : > { %s445_s29 = sshll.u32 %s157_s28, 3  ;;  %s167_s6 = scalar_lea.hbm %s836_s0, %s452_s30 }
  0x13   : > { %s161_s7 = scalar_lea.vmem [#allocation2], %s445_s29  ;;  %s168_s9 = sshll.u32 %s167_s6, 4  ;;  %s169_s9 = int_to_ptr.hbm [resolvable:$true] %s168_s9 }
  0x14   : > { %s170_s8 = sshll.u32 %s161_s7, 4  ;;  %p458_p0 = pnand %p465_p13, %p714_p4  ;;  %s171_s8 = int_to_ptr.vmem [resolvable:$true] %s170_s8 }
  0x15   : > { %p448_p1 = scmp.ge.s32.totalorder %s648_s17, 1  ;;  %s158_s10 = scalar_lea.sflag [#allocation3], %s157_s28 }
  0x16   : > { %s650_s11 = smov 32   ;;  %s651_s18 = smov 2  }
  0x17   : > { %460 = dma.hbm_to_vmem [thread:$0]  (!%p458_p0), %s169_s9, 128, %s171_s8, %s158_s10, %s650_s11, %s650_s11, %s651_s18  }
  0x18   : > { %p187_p2 = scmp.lt.s32.totalorder %s648_s17, 3 }
  0x1a   : > { %p188_p3 = pnand %p448_p1, %p187_p2 }
  0x1b   : > { %s747_s19 = sand.u32 (!%p188_p3), 1, %s632_s13  }
  0x1c   : > { %191 = sbr.rel (%p188_p3) target bundleno = 187 (0xbb), region = 32  ;;  %s449_s21 = sshll.u32 (!%p188_p3), %s747_s19, 3 }
  0x1d   : > { %s194_s23 = scalar_lea.sflag (!%p188_p3), [#allocation3], %s747_s19  ;;  %s197_s29 = scalar_lea.vmem (!%p188_p3), [#allocation2], %s449_s21 }
  0x21   : > { %619 = dma.done.wait (%p720_p8), %s194_s23, 128  }
  0x22   : > { %621 = vsyncadd (%p720_p8), %s194_s23, 4294967168  ;;  %v652_v0 = vmov 0   ;;  %v520_v1 = vld [vmem:[%s838_s2 + $0x2] ss:$0 sm:$0xff]  ;;  %v521_v2 = vld [vmem:[%s838_s2] ss:$0 sm:$0xff]  ;;  %s348_s23 = scalar_lea.hbm %s839_s3, %s640_s15 }
  0x23   : > { %519 = vset.pattern.permute.xlu1 %v652_v0  ;;  %518 = vset.pattern.permute.xlu0 %v652_v0  ;;  %v522_v3 = vld [vmem:[%s838_s2 + $0x3] ss:$0 sm:$0xff]  ;;  %v523_v4 = vld [vmem:[%s838_s2 + $0x1] ss:$0 sm:$0xff]  ;;  %vm238_vm0 = vcmask 1041408   ;;  %p226_p4 = scmp.lt.s32.totalorder %s640_s15, 1 }
  0x24   : > { %307 = vperm.xlu1 %519, %v520_v1   ;;  %299 = vperm.xlu0 %518, %v521_v2   ;;  %v234_v5 = vld [vmem:[%s197_s29 + $0x4] sm:$0x3]  ;;  %v232_v6 = vld [vmem:[%s197_s29] sm:$0x3]  ;;  %v235_v7 = vld [vmem:[%s197_s29 + $0x6] sm:$0x3] }
  0x25   : > { %v241_v8 = vsel %vm238_vm0, %v234_v5, -inf  ;;  %v239_v9 = vsel %vm238_vm0, %v232_v6, -inf  ;;  %v242_v10 = vsel %vm238_vm0, %v235_v7, -inf  ;;  %v233_v11 = vld [vmem:[%s197_s29 + $0x2] sm:$0x3]  ;;  %s227_s8 = scalar_select %p226_p4, %s640_s15, 1 }
  0x26   : > { %v244_v12 = vmax.f32 %v241_v8, %v242_v10  ;;  %v240_v13 = vsel %vm238_vm0, %v233_v11, -inf  ;;  %s225_s29 = scalar_lea.vmem [#allocation5], %s747_s19  ;;  %s352_s28 = sshll.u32 %s348_s23, 4  ;;  %s353_s28 = int_to_ptr.hbm [resolvable:$true] %s352_s28 }
  0x27   : > { %v243_v14 = vmax.f32 %v239_v9, %v240_v13  ;;  %s231_s11 = scalar_lea.vmem %s837_s1, %s227_s8  ;;  %s350_s22 = sshll.u32 %s225_s29, 4  ;;  %s351_s22 = int_to_ptr.vmem [resolvable:$true] %s350_s22 }
  0x28   : > { %v236_v30 = vld [vmem:[%s231_s11] sm:$0x1]  ;;  %s339_s30 = scalar_lea.sflag [#allocation4], %s747_s19  ;;  %s580_s4 = sshra.s32 %s353_s28, 4  ;;  %s581_s4 = int_to_ptr.hbm [resolvable:$true] %s580_s4 }
  0x29   : > { %v245_v15 = vmax.f32 %v243_v14, %v244_v12  ;;  %v237_v33 = vunpack.c.0.s8 %v236_v30  ;;  %s582_s5 = scalar_lea.hbm %s581_s4, 1  ;;  %s586_s15 = scalar_lea.hbm %s839_s3, 2 }
  0x2a   : > { %p583_p5 = scmp.ne.s32.totalorder %s581_s4, %s582_s5  ;;  %p587_p8 = scmp.lt.s32.totalorder %s581_s4, %s839_s3 }
  0x2b   : > { %v246_v16 = vsub.f32 %v232_v6, %v245_v15  ;;  %v247_v17 = vsub.f32 %v233_v11, %v245_v15  ;;  %v248_v19 = vsub.f32 %v234_v5, %v245_v15  ;;  %v249_v21 = vsub.f32 %v235_v7, %v245_v15  ;;  %p588_p10 = scmp.lt.s32.totalorder %s586_s15, %s582_s5 }
  0x2c   : > { %311 = vperm.xlu1 %519, %v522_v3   ;;  %303 = vperm.xlu0 %518, %v523_v4   ;;  %vm268_vm1 = vcmp.eq.s32.totalorder %v237_v33, 0  ;;  %vm269_vm2 = vcmp.eq.s32.totalorder %v237_v33, 1  ;;  %vm270_vm3 = vcmp.eq.s32.totalorder %v237_v33, 2  ;;  %vm271_vm4 = vcmp.eq.s32.totalorder %v237_v33, 3  ;;  %p584_p6 = pnand %p583_p5, %p724_p9 }
  0x2d   : > { %v250_v18 = vmul.f32 1.442695, %v246_v16  ;;  %v252_v20 = vmul.f32 1.442695, %v247_v17  ;;  %v254_v22 = vmul.f32 1.442695, %v248_v19  ;;  %p589_p13 = por %p588_p10, %p587_p8 }
  0x2e   : > { %v256_v23 = vmul.f32 1.442695, %v249_v21  ;;  %v272_v37 = vsel %vm268_vm1, %v232_v6, 0.0  ;;  %v273_v38 = vsel %vm269_vm2, %v233_v11, 0.0  ;;  %v274_v41 = vsel %vm270_vm3, %v234_v5, 0.0  ;;  %p585_p7 = pneg %p584_p6 }
  0x2f   : > { %524 = vpow2.f32 %v250_v18  ;;  %v276_v39 = vsel %vm238_vm0, %v272_v37, 0.0  ;;  %v277_v40 = vsel %vm238_vm0, %v273_v38, 0.0  ;;  %v279_v44 = vsel %vm238_vm0, %v274_v41, 0.0 }
  0x30   : > { %526 = vpow2.f32 %v252_v20  ;;  %v278_v42 = vadd.f32 %v277_v40, %v276_v39  ;;  %v275_v45 = vsel %vm271_vm4, %v235_v7, 0.0  ;;  %p590_p0 = pnand %p589_p13, %p585_p7 }
  0x31   : > { %528 = vpow2.f32 %v254_v22  ;;  %v281_v48 = vsel %vm238_vm0, %v275_v45, 0.0 }
  0x32   : > { %530 = vpow2.f32 %v256_v23  ;;  %v280_v47 = vadd.f32 %v279_v44, %v278_v42 }
  0x34   : > { %v282_v50 = vadd.f32 %v281_v48, %v280_v47 }
  0x35   : > { %v525_v24 = vpop.eup %524 }
  0x36   : > { %v527_v25 = vpop.eup %526  ;;  %v258_v26 = vsel %vm238_vm0, %v525_v24, 0.0 }
  0x37   : > { %v259_v27 = vsel %vm238_vm0, %v527_v25, 0.0  ;;  %v529_v28 = vpop.eup %528 }
  0x38   : > { %v260_v29 = vadd.f32 %v259_v27, %v258_v26  ;;  %v261_v31 = vsel %vm238_vm0, %v529_v28, 0.0  ;;  %v531_v32 = vpop.eup %530 }
  0x39   : > { %v263_v35 = vsel %vm238_vm0, %v531_v32, 0.0 }
  0x3a   : > { %v262_v34 = vadd.f32 %v261_v31, %v260_v29 }
  0x3c   : > { %v264_v36 = vadd.f32 %v263_v35, %v262_v34 }
  0x3e   : > { %532 = vlog2.f32 %v264_v36 }
  0x44   : > { %v533_v43 = vpop.eup %532 }
  0x45   : > { %v266_v46 = vmul.f32 0.6931472, %v533_v43 }
  0x47   : > { %v267_v49 = vadd.f32 %v266_v46, %v245_v15 }
  0x49   : > { %v283_v51 = vsub.f32 %v282_v50, %v267_v49 }
  0x4b   : > { %v284_v52 = vmul.f32 1.442695, %v283_v51 }
  0x4d   : > { %534 = vpow2.f32 %v284_v52 }
  0x53   : > { %v535_v55 = vpop.eup %534 }
  0x54   : > { %v326_v57 = vsub.f32 1.0, %v535_v55 }
  0x56   : > { %v327_v2 = vmul.f32 %v326_v57, %v326_v57 }
  0x58   : > { %v328_v7 = vmul.f32 -1.0, %v327_v2 }
  0x96   : > { %v308_v53 = vpop.permute.xlu1 %307  ;;  %v300_v54 = vpop.permute.xlu0 %299 }
  0x97   : > { %v314_v56 = vsel %vm268_vm1, %v300_v54, 0.0  ;;  %v316_v60 = vsel %vm270_vm3, %v308_v53, 0.0 }
  0x98   : > { %v318_v62 = vsel %vm238_vm0, %v314_v56, 0.0  ;;  %v321_v3 = vsel %vm238_vm0, %v316_v60, 0.0 }
  0x9e   : > { %v312_v58 = vpop.permute.xlu1 %311  ;;  %v304_v59 = vpop.permute.xlu0 %303 }
  0x9f   : > { %v315_v61 = vsel %vm269_vm2, %v304_v59, 0.0  ;;  %v317_v0 = vsel %vm271_vm4, %v312_v58, 0.0 }
  0xa0   : > { %v319_v63 = vsel %vm238_vm0, %v315_v61, 0.0  ;;  %v323_v5 = vsel %vm238_vm0, %v317_v0, 0.0 }
  0xa1   : > { %v320_v1 = vadd.f32 %v319_v63, %v318_v62 }
  0xa3   : > { %v322_v4 = vadd.f32 %v321_v3, %v320_v1 }
  0xa5   : > { %v324_v6 = vadd.f32 %v323_v5, %v322_v4 }
  0xa7   : > { %v325_v8 = vmul.f32 %v324_v6, %v283_v51 }
  0xa9   : > { %v329_v9 = vmul.f32 %v328_v7, %v325_v8 }
  0xab   : > { %v330_v10 = vsel %vm238_vm0, %v329_v9, 0.0 }
  0xac   : > { %v331_v11 = vrot.slane %v330_v10, 4 }
  0xae   : > { %v332_v12 = vadd.f32 %v331_v11, %v330_v10 }
  0xb0   : > { %v333_v13 = vrot.slane %v332_v12, 2 }
  0xb2   : > { %v334_v14 = vadd.f32 %v333_v13, %v332_v12 }
  0xb4   : > { %v335_v15 = vrot.slane %v334_v14, 1 }
  0xb6   : > { %v336_v16 = vadd.f32 %v335_v15, %v334_v14 }
  0xb8   : > { %337 = vst [vmem:[%s225_s29] sm:$0x1] %v336_v16 }
  0xb9   : > { %593 = shalt.err (!%p590_p0)
}
  0xba   : > { %455 = dma.vmem_to_hbm [thread:$0]  (%p724_p9), %s351_s22, 16, %s353_s28, %s339_s30  }
  0xbb PF: > { %s364_s19 = sand.u32 1, %s628_s12   ;;  %p462_p1 = pnand %p444_p12, %p731_p11 }
  0xbc   : > { %s365_s9 = scalar_lea.sflag [#allocation4], %s364_s19 }
  0xbd   : > { %p463_p2 = pneg %p462_p1 }
  0xbf   : > { %623 = dma.done.wait (%p463_p2), %s365_s9, 16  }
  0xc0   : > { %625 = vsyncadd (%p463_p2), %s365_s9, 4294967280  ;;  %s19_s17 = sadd.s32 1, %s648_s17   ;;  %s844_s12 = smov %s632_s13 }
  0xc1   : > { %p16_p3 = scmp.ge.s32.totalorder %s19_s17, 4   ;;  %s845_s13 = smov %s636_s14 }
  0xc2   : > { %s846_s14 = smov %s729_s26  ;;  %s847_s15 = smov %s644_s16 }
  0xc3   : > { %s848_s16 = smov %s850_s20  ;;  %18 = sbr.rel (!%p16_p3) target bundleno = 6 (0x6), region = 80 }
  0xc8   :  { %370 = vsyncpa [#allocation3], 1 }
  0xc9   :  { %372 = vsyncpa [#allocation3 + $0x1], 1 }
  0xca   :  { %373 = vsyncpa [#allocation4], 1 }
  0xcb   :  { %375 = vsyncpa [#allocation4 + $0x1], 1 }

</bundles_post_ra>
